<compile_context>
chip_gen: v7x
topology: tpu7x:2x2x1
jax: 0.10.0
libtpu: 0.0.40
codegen_flags: <defaults>
</compile_context>

<pallas_src>
import jax
import jax.numpy as jnp
from jax.experimental import pallas as pl
from jax.experimental.pallas import tpu as pltpu


def _dma_copy_kernel(x_hbm_ref, o_hbm_ref, copy_sem):
    # Entire ConvNet.forward: y = x, as one HBM->HBM async copy.
    cp = pltpu.make_async_copy(x_hbm_ref, o_hbm_ref, copy_sem)
    cp.start()
    cp.wait()


def convnet_forward(x: jax.Array) -> jax.Array:
    """Pallas implementation of ConvNet.forward (identity)."""
    orig_shape = x.shape
    orig_dtype = x.dtype

    total = 1
    for d in orig_shape:
        total *= d

    # Lane-dense 2D view when possible; flat 1D otherwise.  No (8,128) tiling
    # constraint applies because the kernel never stages through VMEM.
    if total % 128 == 0:
        kshape = (total // 128, 128)
    else:
        kshape = (total,)
    xk = x.reshape(kshape)

    nbytes = total * jnp.dtype(orig_dtype).itemsize

    yk = pl.pallas_call(
        _dma_copy_kernel,
        out_shape=jax.ShapeDtypeStruct(kshape, orig_dtype),
        in_specs=[pl.BlockSpec(memory_space=pl.ANY)],
        out_specs=pl.BlockSpec(memory_space=pl.ANY),
        scratch_shapes=[pltpu.SemaphoreType.DMA(())],
        cost_estimate=pl.CostEstimate(
            flops=0, transcendentals=0, bytes_accessed=2 * nbytes
        ),
    )(xk)

    return yk.reshape(orig_shape)


if __name__ == "__main__":
    key = jax.random.PRNGKey(0)
    # Small NCHW input consistent with a conv-style module: batch=2, C=4, 16x16.
    x = jax.random.normal(key, (2, 4, 16, 16), dtype=jnp.float32)

    y = convnet_forward(x)
    y = jax.block_until_ready(y)

    assert y.shape == x.shape, (y.shape, x.shape)
    assert y.dtype == x.dtype, (y.dtype, x.dtype)
    assert bool(jnp.all(y == x)), "identity forward mismatch"

    print("KERNEL_OK")
</pallas_src>

<mosaic_0001>
module attributes {stable_mosaic.version = 11 : i64} {
  func.func @_dma_copy_kernel(%arg0: memref<16x128xf32, #tpu.memory_space<any>>, %arg1: memref<16x128xf32, #tpu.memory_space<any>>, %arg2: memref<!tpu.dma_semaphore, #tpu.memory_space<semaphore_mem>>) attributes {dimension_semantics = [], scalar_prefetch = 0 : i64, scratch_operands = 1 : i64, tpu.core_type = #tpu.core_type<tc>} {
    tpu.enqueue_dma source(%arg0 : memref<16x128xf32, #tpu.memory_space<any>>) target(%arg1 : memref<16x128xf32, #tpu.memory_space<any>>) target_semaphore(%arg2 : memref<!tpu.dma_semaphore, #tpu.memory_space<semaphore_mem>>)
    tpu.wait_dma2 semaphore(%arg2 : memref<!tpu.dma_semaphore, #tpu.memory_space<semaphore_mem>>) src(%arg0 : memref<16x128xf32, #tpu.memory_space<any>>) dst(%arg1 : memref<16x128xf32, #tpu.memory_space<any>>)
    return
  }
}

</mosaic_0001>

<bundles_post_ra>
// kernel: tpu_custom_call.1
= control target key start
LH: loop header
LB: loop body
LE: loop exit
PB: predicated region body
PF: predicated region fallthrough
CT: control target
= control target key end

     0   :  { %s34_s6 = smov [#allocation2]   ;;  %s35_s7 = smov [#allocation3]   ;;  %s53_s0 = inlined_call_operand.hbm [shape: f32[16,128], index: 0, kind: input, shape index: {}]   ;;  %s54_s1 = inlined_call_operand.hbm [shape: f32[16,128], index: 1, kind: output, shape index: {}]  }
   0x1   :  { %s36_s8 = smov 0  }
   0x2   :  { %18 = dma.general %s53_s0, 256, %s54_s1, %s34_s6, %s35_s7, [#allocation4], %s36_s8, 0  }
   0x3   :  { %32 = dma.done.wait [#allocation2], 256 }
   0x4   :  { %33 = vsyncadd [#allocation2], 4294967040 }
   0x5   :  { %22 = vsyncmov [#allocation2] }
   0x8   :  { %s23_s13 = vpop.sfrf %22 }
   0x9   :  { %p28_p0 = scmp.ne.s32.totalorder %s23_s13, 0 }
   0xb   :  { %27 = shalt.err (%p28_p0)  }

</bundles_post_ra>
